<compile_context>
chip_gen: v5e
topology: v5e:2x2
jax: 0.10.0
libtpu: 0.0.40
codegen_flags: <defaults>
</compile_context>

<pallas_src>
import jax
import jax.numpy as jnp
from jax.experimental import pallas as pl
from jax.experimental.pallas import tpu as pltpu


def _round_up(x, m):
    return (x + m - 1) // m * m


def _layout(V, H, O, L):
    """Row/column offsets of the packed constant blob (shared by init + kernel)."""
    assert H % 8 == 0, "hidden_size must be a multiple of 8"
    G = 4 * H                                   # gate width
    X_off = _round_up(max(V, H), 8)             # start row of the W_hh block
    P = X_off + H                               # fused input width per layer
    O_pad = _round_up(O, 128)                   # lane-dense logits width
    C = max(_round_up(G, 128), O_pad)           # blob lane width
    b_off = L * P                               # bias rows (row b_off + l = bias of layer l)
    lin_off = b_off + _round_up(L, 8)           # W_lin rows
    blin_off = lin_off + _round_up(H, 8)        # b_lin row
    R = blin_off + 8
    return dict(G=G, X_off=X_off, P=P, O_pad=O_pad, C=C,
                b_off=b_off, lin_off=lin_off, blin_off=blin_off, R=R)


# ------------------------------ kernel factory --------------------------------

def build_forward_fns(V, H, O, L):
    lay = _layout(V, H, O, L)
    G, X_off, P, O_pad, C = lay["G"], lay["X_off"], lay["P"], lay["O_pad"], lay["C"]
    b_off, lin_off, blin_off, R = lay["b_off"], lay["lin_off"], lay["blin_off"], lay["R"]

    def kernel(tok_ref, blob_ref, state_in_ref, out_ref, state_ref, xh_ref):
        """One LSTM time step (embedding folded into layer-0 weights) + output Linear."""
        t = pl.program_id(0)
        B = tok_ref.shape[1]

        @pl.when(t == 0)
        def _init():
            # Seed resident state from the caller's hidden; zero the xh scratch once
            # (unused columns stay finite and are masked by zero weight rows).
            state_ref[...] = state_in_ref[...]
            xh_ref[...] = jnp.zeros_like(xh_ref)

        # Token one-hot (embedding + layer-0 bias are folded into the layer-0 weight rows).
        tok = tok_ref[0]                                            # [B, 1] int32
        lane = jax.lax.broadcasted_iota(jnp.int32, (B, V), 1)       # [B, V]
        xh_ref[:, 0:V] = (tok == lane).astype(jnp.float32)

        x_top = None
        for l in range(L):
            h_prev = state_ref[l]                                   # [B, H]
            c_prev = state_ref[L + l]                               # [B, H]
            xh_ref[:, X_off:X_off + H] = h_prev

            w = blob_ref[l * P:(l + 1) * P, :]                      # [P, C] fused [W_x; W_hh]
            b = blob_ref[b_off + l:b_off + l + 1, :]                # [1, C] (zeros for l == 0)
            gates = jnp.dot(xh_ref[...], w,
                            preferred_element_type=jnp.float32) + b # [B, C]
            if C > G:
                gates = gates[:, :G]

            # Activate the full 4H-wide vreg once, slice the activated result.
            sg = jax.nn.sigmoid(gates)
            th = jnp.tanh(gates)
            i_g = sg[:, 0 * H:1 * H]
            f_g = sg[:, 1 * H:2 * H]
            g_g = th[:, 2 * H:3 * H]
            o_g = sg[:, 3 * H:4 * H]

            c_new = f_g * c_prev + i_g * g_g
            h_new = o_g * jnp.tanh(c_new)
            state_ref[l] = h_new
            state_ref[L + l] = c_new
            # nn.LSTM dropout=0.2 between layers is train-time only; eval forward has none.
            if l + 1 < L:
                xh_ref[:, 0:H] = h_new          # feed next layer via the same scratch
            else:
                x_top = h_new

        # Final Linear, lane-padded to O_pad (unmasked stores), sliced in the wrapper.
        w_lin = blob_ref[lin_off:lin_off + H, :]                    # [H, C]
        b_lin = blob_ref[blin_off:blin_off + 1, :]                  # [1, C]
        logits = jnp.dot(x_top, w_lin, preferred_element_type=jnp.float32) + b_lin
        if C > O_pad:
            logits = logits[:, :O_pad]
        out_ref[0] = logits

    def decode(tokens, hidden, blob):
        """Teacher-forced multi-step decode. tokens: [T, B] int32; hidden: (h, c) [L, B, H]."""
        T, B = tokens.shape
        state0 = jnp.concatenate(hidden, axis=0)                    # [2L, B, H]
        tok3 = tokens.reshape(T, B, 1).astype(jnp.int32)

        logits_pad, state_out = pl.pallas_call(
            kernel,
            grid=(T,),
            in_specs=[
                pl.BlockSpec((1, B, 1), lambda t: (t, 0, 0)),        # per-step tokens
                pl.BlockSpec((R, C), lambda t: (0, 0)),              # constants: DMA'd once
                pl.BlockSpec((2 * L, B, H), lambda t: (0, 0, 0)),    # initial state: DMA'd once
            ],
            out_specs=(
                pl.BlockSpec((1, B, O_pad), lambda t: (t, 0, 0)),    # lane-dense logits per step
                pl.BlockSpec((2 * L, B, H), lambda t: (0, 0, 0)),    # resident h/c, one writeback
            ),
            out_shape=(
                jax.ShapeDtypeStruct((T, B, O_pad), jnp.float32),
                jax.ShapeDtypeStruct((2 * L, B, H), jnp.float32),
            ),
            scratch_shapes=[pltpu.VMEM((B, P), jnp.float32)],        # persistent xh buffer
            compiler_params=pltpu.CompilerParams(
                dimension_semantics=("arbitrary",)),                 # sequential recurrence
        )(tok3, blob, state0)

        return logits_pad[:, :, :O], (state_out[:L], state_out[L:])

    decode = jax.jit(decode)

    def forward(tokens, hidden, blob):
        """Mirrors generative_model.forward(input, hidden) -> (output, (h, c))."""
        logits, new_hidden = decode(tokens.reshape(1, -1), hidden, blob)
        return logits[0], new_hidden

    return decode, forward


# ------------------------- deterministic parameter init -----------------------

def init_params(key, vocab_size, embed_dim, hidden_size, output_size, n_layers):
    V, E, H, O, L = vocab_size, embed_dim, hidden_size, output_size, n_layers
    lay = _layout(V, H, O, L)
    G, X_off, P, C = lay["G"], lay["X_off"], lay["P"], lay["C"]
    b_off, lin_off, blin_off, R = lay["b_off"], lay["lin_off"], lay["blin_off"], lay["R"]

    keys = jax.random.split(key, 3 + 4 * L)
    k = iter(keys)
    scale = 0.1

    emb = scale * jax.random.normal(next(k), (V, E), jnp.float32)

    w_ih, w_hh, b = [], [], []
    for l in range(L):
        in_dim = E if l == 0 else H
        w_ih.append(scale * jax.random.normal(next(k), (in_dim, G), jnp.float32))  # transposed
        w_hh.append(scale * jax.random.normal(next(k), (H, G), jnp.float32))       # transposed
        b_ih = scale * jax.random.normal(next(k), (G,), jnp.float32)
        b_hh = scale * jax.random.normal(next(k), (G,), jnp.float32)
        b.append((b_ih + b_hh).reshape(1, G))

    w_lin = scale * jax.random.normal(next(k), (H, O), jnp.float32)
    b_lin = scale * jax.random.normal(next(k), (1, O), jnp.float32)

    # ---- pack all constants into one 8-row-aligned, 128-lane f32 blob ----
    blob = jnp.zeros((R, C), jnp.float32)
    for l in range(L):
        base = l * P
        if l == 0:
            # fold embedding + layer-0 bias: onehot @ E0 == emb[tok] @ W_ih0 + b0
            e0 = emb @ w_ih[0] + b[0]                               # [V, G]
            blob = blob.at[base:base + V, :G].set(e0)
        else:
            blob = blob.at[base:base + H, :G].set(w_ih[l])
            blob = blob.at[b_off + l, :G].set(b[l][0])
        blob = blob.at[base + X_off:base + X_off + H, :G].set(w_hh[l])
    blob = blob.at[lin_off:lin_off + H, :O].set(w_lin)
    blob = blob.at[blin_off, :O].set(b_lin[0])

    return {
        "blob": blob,
        # unfused copies used only by the pure-JAX reference check
        "embedding": emb, "w_ih": w_ih, "w_hh": w_hh, "b": b,
        "w_lin": w_lin, "b_lin": b_lin,
    }


# -------------------------- pure-JAX reference (check) ------------------------

def _reference_step(tokens, hidden, params):
    x = jnp.take(params["embedding"], tokens, axis=0)
    h_prev, c_prev = hidden
    H = h_prev.shape[-1]
    h_list, c_list = [], []
    for l in range(h_prev.shape[0]):
        gates = x @ params["w_ih"][l] + h_prev[l] @ params["w_hh"][l] + params["b"][l]
        i_g = jax.nn.sigmoid(gates[:, 0 * H:1 * H])
        f_g = jax.nn.sigmoid(gates[:, 1 * H:2 * H])
        g_g = jnp.tanh(gates[:, 2 * H:3 * H])
        o_g = jax.nn.sigmoid(gates[:, 3 * H:4 * H])
        c_new = f_g * c_prev[l] + i_g * g_g
        h_new = o_g * jnp.tanh(c_new)
        h_list.append(h_new)
        c_list.append(c_new)
        x = h_new
    out = x @ params["w_lin"] + params["b_lin"]
    return out, (jnp.stack(h_list), jnp.stack(c_list))


def _reference_decode(tokens_TB, hidden, params):
    outs = []
    for t in range(tokens_TB.shape[0]):
        o, hidden = _reference_step(tokens_TB[t], hidden, params)
        outs.append(o)
    return jnp.stack(outs), hidden


# ----------------------------------- main --------------------------------------

if __name__ == "__main__":
    # Small shapes consistent with the module (forward() is a single seq_len == 1 step).
    batch_size = 8
    vocab_size = 16
    embedding_dimension = 16
    hidden_size = 32
    output_size = vocab_size
    n_layers = 3
    T = 6   # teacher-forced steps for the multi-step (single pallas_call) path

    root = jax.random.PRNGKey(0)
    k_params, k_tok = jax.random.split(root)

    params = init_params(k_params, vocab_size, embedding_dimension,
                         hidden_size, output_size, n_layers)
    decode, forward = build_forward_fns(vocab_size, hidden_size, output_size, n_layers)

    hidden0 = (jnp.zeros((n_layers, batch_size, hidden_size), jnp.float32),
               jnp.zeros((n_layers, batch_size, hidden_size), jnp.float32))

    # ---- single step: exactly generative_model.forward(input, hidden) ----
    tokens1 = jax.random.randint(k_tok, (batch_size,), 0, vocab_size, dtype=jnp.int32)
    out, (h1, c1) = forward(tokens1, hidden0, params["blob"])
    jax.block_until_ready((out, h1, c1))
    ref_out, (ref_h, ref_c) = _reference_step(tokens1, hidden0, params)
    assert jnp.allclose(out, ref_out, atol=1e-5), "single-step logits mismatch"
    assert jnp.allclose(h1, ref_h, atol=1e-5), "single-step h mismatch"
    assert jnp.allclose(c1, ref_c, atol=1e-5), "single-step c mismatch"

    # ---- T teacher-forced steps in ONE pallas_call (grid over T, state resident) ----
    tokens_T = jax.random.randint(jax.random.fold_in(k_tok, 1), (T, batch_size),
                                  0, vocab_size, dtype=jnp.int32)
    logits_T, (hT, cT) = decode(tokens_T, hidden0, params["blob"])
    jax.block_until_ready((logits_T, hT, cT))
    ref_logits_T, (ref_hT, ref_cT) = _reference_decode(tokens_T, hidden0, params)
    assert jnp.allclose(logits_T, ref_logits_T, atol=1e-5), "decode logits mismatch"
    assert jnp.allclose(hT, ref_hT, atol=1e-5), "decode h mismatch"
    assert jnp.allclose(cT, ref_cT, atol=1e-5), "decode c mismatch"

    print("KERNEL_OK")
</pallas_src>

<mosaic_0001>
module attributes {stable_mosaic.version = 11 : i64} {
  func.func @kernel(%arg0: i32, %arg1: memref<1x8x1xi32, #tpu.memory_space<vmem>>, %arg2: memref<240x128xf32, #tpu.memory_space<vmem>>, %arg3: memref<6x8x32xf32, #tpu.memory_space<vmem>>, %arg4: memref<1x8x128xf32, #tpu.memory_space<vmem>>, %arg5: memref<6x8x32xf32, #tpu.memory_space<vmem>>, %arg6: memref<8x64xf32, #tpu.memory_space<vmem>>) attributes {dimension_semantics = [#tpu.dimension_semantics<arbitrary>], iteration_bounds = array<i64: 1>, scalar_prefetch = 0 : i64, scratch_operands = 1 : i64, tpu.core_type = #tpu.core_type<tc>, window_params = [{transform_indices = @transform_0, window_bounds = array<i64: 1, 8, 1>}, {pipeline_mode = #tpu.pipeline_mode<synchronous>, transform_indices = @transform_1, window_bounds = array<i64: 240, 128>}, {pipeline_mode = #tpu.pipeline_mode<synchronous>, transform_indices = @transform_2, window_bounds = array<i64: 6, 8, 32>}, {transform_indices = @transform_3, window_bounds = array<i64: 1, 8, 128>}, {pipeline_mode = #tpu.pipeline_mode<synchronous>, transform_indices = @transform_4, window_bounds = array<i64: 6, 8, 32>}]} {
    %c0_i32 = arith.constant 0 : i32
    %0 = arith.cmpi eq, %arg0, %c0_i32 : i32
    %1 = arith.extui %0 : i1 to i32
    %c0_i32_0 = arith.constant 0 : i32
    %2 = arith.cmpi ne, %1, %c0_i32_0 : i32
    scf.if %2 {
      %c0_69 = arith.constant 0 : index
      %c0_70 = arith.constant 0 : index
      %c0_71 = arith.constant 0 : index
      %117 = vector.load %arg3[%c0_69, %c0_70, %c0_71] : memref<6x8x32xf32, #tpu.memory_space<vmem>>, vector<6x8x32xf32>
      %c0_72 = arith.constant 0 : index
      %c0_73 = arith.constant 0 : index
      %c0_74 = arith.constant 0 : index
      %118 = vector.load %arg5[%c0_72, %c0_73, %c0_74] : memref<6x8x32xf32, #tpu.memory_space<vmem>>, vector<6x8x32xf32>
      tpu.vector_store %arg5[%c0_72, %c0_73, %c0_74], %117 {strides = array<i32>} : memref<6x8x32xf32, #tpu.memory_space<vmem>>, vector<6x8x32xf32>,
      %cst_75 = arith.constant 0.000000e+00 : f32
      %119 = vector.broadcast %cst_75 : f32 to vector<8x64xf32>
      %c0_76 = arith.constant 0 : index
      %c0_77 = arith.constant 0 : index
      %120 = vector.load %arg6[%c0_76, %c0_77] : memref<8x64xf32, #tpu.memory_space<vmem>>, vector<8x64xf32>
      tpu.vector_store %arg6[%c0_76, %c0_77], %119 {strides = array<i32>} : memref<8x64xf32, #tpu.memory_space<vmem>>, vector<8x64xf32>,
    } else {
    }
    %c0 = arith.constant 0 : index
    %c0_1 = arith.constant 0 : index
    %c0_2 = arith.constant 0 : index
    %3 = vector.load %arg1[%c0, %c0_1, %c0_2] : memref<1x8x1xi32, #tpu.memory_space<vmem>>, vector<1x8x1xi32>
    %4 = vector.shape_cast %3 : vector<1x8x1xi32> to vector<8x1xi32>
    %5 = tpu.iota {dimensions = array<i32: 1>} : vector<8x16xi32>
    %6 = vector.broadcast %4 : vector<8x1xi32> to vector<8x16xi32>
    %7 = arith.cmpi eq, %6, %5 : vector<8x16xi32>
    %8 = arith.extui %7 : vector<8x16xi1> to vector<8x16xi32>
    %9 = arith.sitofp %8 : vector<8x16xi32> to vector<8x16xf32>
    %c0_3 = arith.constant 0 : index
    %c0_4 = arith.constant 0 : index
    %10 = vector.load %arg6[%c0_3, %c0_4] : memref<8x64xf32, #tpu.memory_space<vmem>>, vector<8x16xf32>
    tpu.vector_store %arg6[%c0_3, %c0_4], %9 {strides = array<i32>} : memref<8x64xf32, #tpu.memory_space<vmem>>, vector<8x16xf32>,
    %c0_5 = arith.constant 0 : index
    %c0_6 = arith.constant 0 : index
    %c0_7 = arith.constant 0 : index
    %11 = vector.load %arg5[%c0_5, %c0_6, %c0_7] : memref<6x8x32xf32, #tpu.memory_space<vmem>>, vector<1x8x32xf32>
    %12 = vector.shape_cast %11 : vector<1x8x32xf32> to vector<8x32xf32>
    %c3 = arith.constant 3 : index
    %c0_8 = arith.constant 0 : index
    %c0_9 = arith.constant 0 : index
    %13 = vector.load %arg5[%c3, %c0_8, %c0_9] : memref<6x8x32xf32, #tpu.memory_space<vmem>>, vector<1x8x32xf32>
    %14 = vector.shape_cast %13 : vector<1x8x32xf32> to vector<8x32xf32>
    %c0_10 = arith.constant 0 : index
    %c32 = arith.constant 32 : index
    %15 = vector.load %arg6[%c0_10, %c32] : memref<8x64xf32, #tpu.memory_space<vmem>>, vector<8x32xf32>
    tpu.vector_store %arg6[%c0_10, %c32], %12 {strides = array<i32>} : memref<8x64xf32, #tpu.memory_space<vmem>>, vector<8x32xf32>,
    %c0_11 = arith.constant 0 : index
    %c0_12 = arith.constant 0 : index
    %16 = vector.load %arg2[%c0_11, %c0_12] : memref<240x128xf32, #tpu.memory_space<vmem>>, vector<64x128xf32>
    %c192 = arith.constant 192 : index
    %c0_13 = arith.constant 0 : index
    %17 = vector.load %arg2[%c192, %c0_13] : memref<240x128xf32, #tpu.memory_space<vmem>>, vector<1x128xf32>
    %c0_14 = arith.constant 0 : index
    %c0_15 = arith.constant 0 : index
    %18 = vector.load %arg6[%c0_14, %c0_15] : memref<8x64xf32, #tpu.memory_space<vmem>>, vector<8x64xf32>
    %cst = arith.constant dense<0.000000e+00> : vector<8x128xf32>
    %19 = tpu.matmul %18, %16, %cst {dimension_numbers = #tpu.dot_dimension_numbers<[1], [0], [0], [1], [0, 0, 1, 1], [], []>} : vector<8x64xf32>, vector<64x128xf32>, vector<8x128xf32> -> vector<8x128xf32>
    %20 = vector.broadcast %17 : vector<1x128xf32> to vector<8x128xf32>
    %21 = arith.addf %19, %20 : vector<8x128xf32>
    %22 = arith.negf %21 : vector<8x128xf32>
    %23 = math.exp %22 : vector<8x128xf32>
    %cst_16 = arith.constant 1.000000e+00 : f32
    %24 = vector.broadcast %cst_16 : f32 to vector<8x128xf32>
    %25 = arith.addf %24, %23 : vector<8x128xf32>
    %26 = arith.divf %24, %25 : vector<8x128xf32>
    %27 = math.tanh %21 : vector<8x128xf32>
    %28 = vector.extract_strided_slice %26 {offsets = [0, 0], sizes = [8, 32], strides = [1, 1]} : vector<8x128xf32> to vector<8x32xf32>
    %29 = vector.extract_strided_slice %26 {offsets = [0, 32], sizes = [8, 32], strides = [1, 1]} : vector<8x128xf32> to vector<8x32xf32>
    %30 = vector.extract_strided_slice %27 {offsets = [0, 64], sizes = [8, 32], strides = [1, 1]} : vector<8x128xf32> to vector<8x32xf32>
    %31 = vector.extract_strided_slice %26 {offsets = [0, 96], sizes = [8, 32], strides = [1, 1]} : vector<8x128xf32> to vector<8x32xf32>
    %32 = arith.mulf %29, %14 : vector<8x32xf32>
    %33 = arith.mulf %28, %30 : vector<8x32xf32>
    %34 = arith.addf %32, %33 : vector<8x32xf32>
    %35 = math.tanh %34 : vector<8x32xf32>
    %36 = arith.mulf %31, %35 : vector<8x32xf32>
    %c0_17 = arith.constant 0 : index
    %c0_18 = arith.constant 0 : index
    %c0_19 = arith.constant 0 : index
    %37 = vector.load %arg5[%c0_17, %c0_18, %c0_19] : memref<6x8x32xf32, #tpu.memory_space<vmem>>, vector<1x8x32xf32>
    %38 = vector.shape_cast %37 : vector<1x8x32xf32> to vector<8x32xf32>
    %39 = vector.shape_cast %36 : vector<8x32xf32> to vector<1x8x32xf32>
    tpu.vector_store %arg5[%c0_17, %c0_18, %c0_19], %39 {strides = array<i32>} : memref<6x8x32xf32, #tpu.memory_space<vmem>>, vector<1x8x32xf32>,
    %c3_20 = arith.constant 3 : index
    %c0_21 = arith.constant 0 : index
    %c0_22 = arith.constant 0 : index
    %40 = vector.load %arg5[%c3_20, %c0_21, %c0_22] : memref<6x8x32xf32, #tpu.memory_space<vmem>>, vector<1x8x32xf32>
    %41 = vector.shape_cast %40 : vector<1x8x32xf32> to vector<8x32xf32>
    %42 = vector.shape_cast %34 : vector<8x32xf32> to vector<1x8x32xf32>
    tpu.vector_store %arg5[%c3_20, %c0_21, %c0_22], %42 {strides = array<i32>} : memref<6x8x32xf32, #tpu.memory_space<vmem>>, vector<1x8x32xf32>,
    %c0_23 = arith.constant 0 : index
    %c0_24 = arith.constant 0 : index
    %43 = vector.load %arg6[%c0_23, %c0_24] : memref<8x64xf32, #tpu.memory_space<vmem>>, vector<8x32xf32>
    tpu.vector_store %arg6[%c0_23, %c0_24], %36 {strides = array<i32>} : memref<8x64xf32, #tpu.memory_space<vmem>>, vector<8x32xf32>,
    %c1 = arith.constant 1 : index
    %c0_25 = arith.constant 0 : index
    %c0_26 = arith.constant 0 : index
    %44 = vector.load %arg5[%c1, %c0_25, %c0_26] : memref<6x8x32xf32, #tpu.memory_space<vmem>>, vector<1x8x32xf32>
    %45 = vector.shape_cast %44 : vector<1x8x32xf32> to vector<8x32xf32>
    %c4 = arith.constant 4 : index
    %c0_27 = arith.constant 0 : index
    %c0_28 = arith.constant 0 : index
    %46 = vector.load %arg5[%c4, %c0_27, %c0_28] : memref<6x8x32xf32, #tpu.memory_space<vmem>>, vector<1x8x32xf32>
    %47 = vector.shape_cast %46 : vector<1x8x32xf32> to vector<8x32xf32>
    %c0_29 = arith.constant 0 : index
    %c32_30 = arith.constant 32 : index
    %48 = vector.load %arg6[%c0_29, %c32_30] : memref<8x64xf32, #tpu.memory_space<vmem>>, vector<8x32xf32>
    tpu.vector_store %arg6[%c0_29, %c32_30], %45 {strides = array<i32>} : memref<8x64xf32, #tpu.memory_space<vmem>>, vector<8x32xf32>,
    %c64 = arith.constant 64 : index
    %c0_31 = arith.constant 0 : index
    %49 = vector.load %arg2[%c64, %c0_31] : memref<240x128xf32, #tpu.memory_space<vmem>>, vector<64x128xf32>
    %c193 = arith.constant 193 : index
    %c0_32 = arith.constant 0 : index
    %50 = vector.load %arg2[%c193, %c0_32] : memref<240x128xf32, #tpu.memory_space<vmem>>, vector<1x128xf32>
    %c0_33 = arith.constant 0 : index
    %c0_34 = arith.constant 0 : index
    %51 = vector.load %arg6[%c0_33, %c0_34] : memref<8x64xf32, #tpu.memory_space<vmem>>, vector<8x64xf32>
    %cst_35 = arith.constant dense<0.000000e+00> : vector<8x128xf32>
    %52 = tpu.matmul %51, %49, %cst_35 {dimension_numbers = #tpu.dot_dimension_numbers<[1], [0], [0], [1], [0, 0, 1, 1], [], []>} : vector<8x64xf32>, vector<64x128xf32>, vector<8x128xf32> -> vector<8x128xf32>
    %53 = vector.broadcast %50 : vector<1x128xf32> to vector<8x128xf32>
    %54 = arith.addf %52, %53 : vector<8x128xf32>
    %55 = arith.negf %54 : vector<8x128xf32>
    %56 = math.exp %55 : vector<8x128xf32>
    %cst_36 = arith.constant 1.000000e+00 : f32
    %57 = vector.broadcast %cst_36 : f32 to vector<8x128xf32>
    %58 = arith.addf %57, %56 : vector<8x128xf32>
    %59 = arith.divf %57, %58 : vector<8x128xf32>
    %60 = math.tanh %54 : vector<8x128xf32>
    %61 = vector.extract_strided_slice %59 {offsets = [0, 0], sizes = [8, 32], strides = [1, 1]} : vector<8x128xf32> to vector<8x32xf32>
    %62 = vector.extract_strided_slice %59 {offsets = [0, 32], sizes = [8, 32], strides = [1, 1]} : vector<8x128xf32> to vector<8x32xf32>
    %63 = vector.extract_strided_slice %60 {offsets = [0, 64], sizes = [8, 32], strides = [1, 1]} : vector<8x128xf32> to vector<8x32xf32>
    %64 = vector.extract_strided_slice %59 {offsets = [0, 96], sizes = [8, 32], strides = [1, 1]} : vector<8x128xf32> to vector<8x32xf32>
    %65 = arith.mulf %62, %47 : vector<8x32xf32>
    %66 = arith.mulf %61, %63 : vector<8x32xf32>
    %67 = arith.addf %65, %66 : vector<8x32xf32>
    %68 = math.tanh %67 : vector<8x32xf32>
    %69 = arith.mulf %64, %68 : vector<8x32xf32>
    %c1_37 = arith.constant 1 : index
    %c0_38 = arith.constant 0 : index
    %c0_39 = arith.constant 0 : index
    %70 = vector.load %arg5[%c1_37, %c0_38, %c0_39] : memref<6x8x32xf32, #tpu.memory_space<vmem>>, vector<1x8x32xf32>
    %71 = vector.shape_cast %70 : vector<1x8x32xf32> to vector<8x32xf32>
    %72 = vector.shape_cast %69 : vector<8x32xf32> to vector<1x8x32xf32>
    tpu.vector_store %arg5[%c1_37, %c0_38, %c0_39], %72 {strides = array<i32>} : memref<6x8x32xf32, #tpu.memory_space<vmem>>, vector<1x8x32xf32>,
    %c4_40 = arith.constant 4 : index
    %c0_41 = arith.constant 0 : index
    %c0_42 = arith.constant 0 : index
    %73 = vector.load %arg5[%c4_40, %c0_41, %c0_42] : memref<6x8x32xf32, #tpu.memory_space<vmem>>, vector<1x8x32xf32>
    %74 = vector.shape_cast %73 : vector<1x8x32xf32> to vector<8x32xf32>
    %75 = vector.shape_cast %67 : vector<8x32xf32> to vector<1x8x32xf32>
    tpu.vector_store %arg5[%c4_40, %c0_41, %c0_42], %75 {strides = array<i32>} : memref<6x8x32xf32, #tpu.memory_space<vmem>>, vector<1x8x32xf32>,
    %c0_43 = arith.constant 0 : index
    %c0_44 = arith.constant 0 : index
    %76 = vector.load %arg6[%c0_43, %c0_44] : memref<8x64xf32, #tpu.memory_space<vmem>>, vector<8x32xf32>
    tpu.vector_store %arg6[%c0_43, %c0_44], %69 {strides = array<i32>} : memref<8x64xf32, #tpu.memory_space<vmem>>, vector<8x32xf32>,
    %c2 = arith.constant 2 : index
    %c0_45 = arith.constant 0 : index
    %c0_46 = arith.constant 0 : index
    %77 = vector.load %arg5[%c2, %c0_45, %c0_46] : memref<6x8x32xf32, #tpu.memory_space<vmem>>, vector<1x8x32xf32>
    %78 = vector.shape_cast %77 : vector<1x8x32xf32> to vector<8x32xf32>
    %c5 = arith.constant 5 : index
    %c0_47 = arith.constant 0 : index
    %c0_48 = arith.constant 0 : index
    %79 = vector.load %arg5[%c5, %c0_47, %c0_48] : memref<6x8x32xf32, #tpu.memory_space<vmem>>, vector<1x8x32xf32>
    %80 = vector.shape_cast %79 : vector<1x8x32xf32> to vector<8x32xf32>
    %c0_49 = arith.constant 0 : index
    %c32_50 = arith.constant 32 : index
    %81 = vector.load %arg6[%c0_49, %c32_50] : memref<8x64xf32, #tpu.memory_space<vmem>>, vector<8x32xf32>
    tpu.vector_store %arg6[%c0_49, %c32_50], %78 {strides = array<i32>} : memref<8x64xf32, #tpu.memory_space<vmem>>, vector<8x32xf32>,
    %c128 = arith.constant 128 : index
    %c0_51 = arith.constant 0 : index
    %82 = vector.load %arg2[%c128, %c0_51] : memref<240x128xf32, #tpu.memory_space<vmem>>, vector<64x128xf32>
    %c194 = arith.constant 194 : index
    %c0_52 = arith.constant 0 : index
    %83 = vector.load %arg2[%c194, %c0_52] : memref<240x128xf32, #tpu.memory_space<vmem>>, vector<1x128xf32>
    %c0_53 = arith.constant 0 : index
    %c0_54 = arith.constant 0 : index
    %84 = vector.load %arg6[%c0_53, %c0_54] : memref<8x64xf32, #tpu.memory_space<vmem>>, vector<8x64xf32>
    %cst_55 = arith.constant dense<0.000000e+00> : vector<8x128xf32>
    %85 = tpu.matmul %84, %82, %cst_55 {dimension_numbers = #tpu.dot_dimension_numbers<[1], [0], [0], [1], [0, 0, 1, 1], [], []>} : vector<8x64xf32>, vector<64x128xf32>, vector<8x128xf32> -> vector<8x128xf32>
    %86 = vector.broadcast %83 : vector<1x128xf32> to vector<8x128xf32>
    %87 = arith.addf %85, %86 : vector<8x128xf32>
    %88 = arith.negf %87 : vector<8x128xf32>
    %89 = math.exp %88 : vector<8x128xf32>
    %cst_56 = arith.constant 1.000000e+00 : f32
    %90 = vector.broadcast %cst_56 : f32 to vector<8x128xf32>
    %91 = arith.addf %90, %89 : vector<8x128xf32>
    %92 = arith.divf %90, %91 : vector<8x128xf32>
    %93 = math.tanh %87 : vector<8x128xf32>
    %94 = vector.extract_strided_slice %92 {offsets = [0, 0], sizes = [8, 32], strides = [1, 1]} : vector<8x128xf32> to vector<8x32xf32>
    %95 = vector.extract_strided_slice %92 {offsets = [0, 32], sizes = [8, 32], strides = [1, 1]} : vector<8x128xf32> to vector<8x32xf32>
    %96 = vector.extract_strided_slice %93 {offsets = [0, 64], sizes = [8, 32], strides = [1, 1]} : vector<8x128xf32> to vector<8x32xf32>
    %97 = vector.extract_strided_slice %92 {offsets = [0, 96], sizes = [8, 32], strides = [1, 1]} : vector<8x128xf32> to vector<8x32xf32>
    %98 = arith.mulf %95, %80 : vector<8x32xf32>
    %99 = arith.mulf %94, %96 : vector<8x32xf32>
    %100 = arith.addf %98, %99 : vector<8x32xf32>
    %101 = math.tanh %100 : vector<8x32xf32>
    %102 = arith.mulf %97, %101 : vector<8x32xf32>
    %c2_57 = arith.constant 2 : index
    %c0_58 = arith.constant 0 : index
    %c0_59 = arith.constant 0 : index
    %103 = vector.load %arg5[%c2_57, %c0_58, %c0_59] : memref<6x8x32xf32, #tpu.memory_space<vmem>>, vector<1x8x32xf32>
    %104 = vector.shape_cast %103 : vector<1x8x32xf32> to vector<8x32xf32>
    %105 = vector.shape_cast %102 : vector<8x32xf32> to vector<1x8x32xf32>
    tpu.vector_store %arg5[%c2_57, %c0_58, %c0_59], %105 {strides = array<i32>} : memref<6x8x32xf32, #tpu.memory_space<vmem>>, vector<1x8x32xf32>,
    %c5_60 = arith.constant 5 : index
    %c0_61 = arith.constant 0 : index
    %c0_62 = arith.constant 0 : index
    %106 = vector.load %arg5[%c5_60, %c0_61, %c0_62] : memref<6x8x32xf32, #tpu.memory_space<vmem>>, vector<1x8x32xf32>
    %107 = vector.shape_cast %106 : vector<1x8x32xf32> to vector<8x32xf32>
    %108 = vector.shape_cast %100 : vector<8x32xf32> to vector<1x8x32xf32>
    tpu.vector_store %arg5[%c5_60, %c0_61, %c0_62], %108 {strides = array<i32>} : memref<6x8x32xf32, #tpu.memory_space<vmem>>, vector<1x8x32xf32>,
    %c200 = arith.constant 200 : index
    %c0_63 = arith.constant 0 : index
    %109 = vector.load %arg2[%c200, %c0_63] : memref<240x128xf32, #tpu.memory_space<vmem>>, vector<32x128xf32>
    %c232 = arith.constant 232 : index
    %c0_64 = arith.constant 0 : index
    %110 = vector.load %arg2[%c232, %c0_64] : memref<240x128xf32, #tpu.memory_space<vmem>>, vector<1x128xf32>
    %cst_65 = arith.constant dense<0.000000e+00> : vector<8x128xf32>
    %111 = tpu.matmul %102, %109, %cst_65 {dimension_numbers = #tpu.dot_dimension_numbers<[1], [0], [0], [1], [0, 0, 1, 1], [], []>} : vector<8x32xf32>, vector<32x128xf32>, vector<8x128xf32> -> vector<8x128xf32>
    %112 = vector.broadcast %110 : vector<1x128xf32> to vector<8x128xf32>
    %113 = arith.addf %111, %112 : vector<8x128xf32>
    %c0_66 = arith.constant 0 : index
    %c0_67 = arith.constant 0 : index
    %c0_68 = arith.constant 0 : index
    %114 = vector.load %arg4[%c0_66, %c0_67, %c0_68] : memref<1x8x128xf32, #tpu.memory_space<vmem>>, vector<1x8x128xf32>
    %115 = vector.shape_cast %114 : vector<1x8x128xf32> to vector<8x128xf32>
    %116 = vector.shape_cast %113 : vector<8x128xf32> to vector<1x8x128xf32>
    tpu.vector_store %arg4[%c0_66, %c0_67, %c0_68], %116 {strides = array<i32>} : memref<1x8x128xf32, #tpu.memory_space<vmem>>, vector<1x8x128xf32>,
    return
  }
  func.func @transform_0(%arg0: i32) -> (i32, i32, i32) {
    %c0_i32 = arith.constant 0 : i32
    %c0_i32_0 = arith.constant 0 : i32
    %c0_i32_1 = arith.constant 0 : i32
    return %arg0, %c0_i32, %c0_i32_0 : i32, i32, i32
  }
  func.func @transform_1(%arg0: i32) -> (i32, i32) {
    %c0_i32 = arith.constant 0 : i32
    %c0_i32_0 = arith.constant 0 : i32
    %c0_i32_1 = arith.constant 0 : i32
    return %c0_i32, %c0_i32_0 : i32, i32
  }
  func.func @transform_2(%arg0: i32) -> (i32, i32, i32) {
    %c0_i32 = arith.constant 0 : i32
    %c0_i32_0 = arith.constant 0 : i32
    %c0_i32_1 = arith.constant 0 : i32
    %c0_i32_2 = arith.constant 0 : i32
    return %c0_i32, %c0_i32_0, %c0_i32_1 : i32, i32, i32
  }
  func.func @transform_3(%arg0: i32) -> (i32, i32, i32) {
    %c0_i32 = arith.constant 0 : i32
    %c0_i32_0 = arith.constant 0 : i32
    %c0_i32_1 = arith.constant 0 : i32
    return %arg0, %c0_i32, %c0_i32_0 : i32, i32, i32
  }
  func.func @transform_4(%arg0: i32) -> (i32, i32, i32) {
    %c0_i32 = arith.constant 0 : i32
    %c0_i32_0 = arith.constant 0 : i32
    %c0_i32_1 = arith.constant 0 : i32
    %c0_i32_2 = arith.constant 0 : i32
    return %c0_i32, %c0_i32_0, %c0_i32_1 : i32, i32, i32
  }
}

</mosaic_0001>

<bundles_post_ra>
// kernel: decode.1
= control target key start
LH: loop header
LB: loop body
LE: loop exit
PB: predicated region body
PF: predicated region fallthrough
CT: control target
= control target key end

     0   :  { %10 = vsyncpa [#allocation4], 0  ;;  %s670_s0 = inlined_call_operand.vmem [shape: s32[1,8,1], index: 0, kind: input, shape index: {}]   ;;  %s671_s1 = inlined_call_operand.hbm [shape: f32[240,128], index: 1, kind: input, shape index: {}]   ;;  %s672_s2 = inlined_call_operand.vmem [shape: f32[6,8,32], index: 2, kind: input, shape index: {}]   ;;  %s673_s3 = inlined_call_operand.hbm [shape: f32[1,8,128], index: 3, kind: output, shape index: {0}]   ;;  %s674_s4 = inlined_call_operand.vmem [shape: f32[6,8,32], index: 4, kind: output, shape index: {1}]  }
   0x1   :  { %11 = vsyncpa [#allocation5], 0  ;;  %s18_s17 = sshll.u32 %s671_s1, 4  ;;  %s507_s18 = smov [#allocation3]   ;;  %s19_s17 = int_to_ptr.hbm [resolvable:$true] %s18_s17 }
   0x2   :  { %s20_s19 = sshll.u32 %s507_s18, 4  ;;  %s508_s20 = smov 128   ;;  %s21_s19 = int_to_ptr.vmem [resolvable:$true] %s20_s19 }
   0x3   :  { %s509_s21 = smov 8  }
   0x4   :  { %26 = dma.hbm_to_vmem [thread:$0]  %s19_s17, 3840, %s21_s19, [#allocation4], %s508_s20, %s508_s20, %s509_s21  }
   0x5   :  { %503 = dma.done.wait [#allocation4], 3840  }
   0x6   :  { %504 = vsyncadd [#allocation4], 4294963456  ;;  %v510_v0 = vmov 0   ;;  %vm43_vm0 = vcmask 261120   ;;  %v52_v1 = vld [vmem:[%s670_s0] sm:$0xff]  ;;  %s511_s29 = smov 32   ;;  %v53_v13 = vlaneseq }
   0x7   :  { %426 = vset.pattern.permute.xlu0 %v510_v0  ;;  %v37_v2 = vld [vmem:[%s672_s2] sm:$0xff]  ;;  %vm50_vm1 = vcmask 523264   ;;  %v78_v5 = vld [vmem:[#allocation3 + $0x30] sm:$0xff]  ;;  %v512_v6 = vmov 0.0   ;;  %v77_v7 = vld [vmem:[#allocation3 + $0x28] sm:$0xff]  ;;  %vm61_vm2 = vcmask 130048  }
   0x8   :  { %56 = vperm.xlu0 %426, %v52_v1   ;;  %44 = vst.msk [vmem:[%s674_s4] sm:$0xff] %vm43_vm0, %v37_v2  ;;  %v79_v4 = vld [vmem:[#allocation3 + $0x38] sm:$0xff]  ;;  %v76_v8 = vld [vmem:[#allocation3 + $0x20] sm:$0xff]  ;;  %v74_v10 = vld [vmem:[#allocation3 + $0x10] sm:$0xff]  ;;  %v54_v14 = vand.u32 127, %v53_v13  ;;  %vm70_vm4 = vcmask 523520  }
   0x9   :  { %95 = vmatpush.msra.mxu0 %v79_v4  ;;  %51 = vst.msk [vmem:[#allocation2] sm:$0xff] %vm50_vm1, %v512_v6  ;;  %v75_v9 = vld [vmem:[#allocation3 + $0x18] sm:$0xff]  ;;  %v73_v11 = vld [vmem:[#allocation3 + $0x8] sm:$0xff]  ;;  %v72_v12 = vld [vmem:[#allocation3] sm:$0xff]  ;;  %s513_s7 = smov 64   ;;  %s385_s22 = sshll.u32 %s673_s3, 4  ;;  %s386_s22 = int_to_ptr.hbm [resolvable:$true] %s385_s22 }
   0xa   :  { %v40_v19 = vld [vmem:[%s672_s2 + $0x18] sm:$0xff]  ;;  %v427_v20 = vld [vmem:[#allocation3 + $0xc0] ss:$0 sm:$0xff]  ;;  %v176_v47 = vld [vmem:[#allocation3 + $0x78] sm:$0xff] }
   0xb   :  { %96 = vmatpush.msra.mxu0 %v78_v5  ;;  %47 = vst.msk [vmem:[%s674_s4 + $0x18] sm:$0xff] %vm43_vm0, %v40_v19  ;;  %v38_v45 = vld [vmem:[%s672_s2 + $0x8] sm:$0xff]  ;;  %v175_v48 = vld [vmem:[#allocation3 + $0x70] sm:$0xff]  ;;  %191 = vmatpush.msra.mxu1 %v176_v47  ;;  %v174_v49 = vld [vmem:[#allocation3 + $0x68] sm:$0xff] }
   0xc   :  { %45 = vst.msk [vmem:[%s674_s4 + $0x8] sm:$0xff] %vm43_vm0, %v38_v45  ;;  %v173_v52 = vld [vmem:[#allocation3 + $0x60] sm:$0xff]  ;;  %v172_v53 = vld [vmem:[#allocation3 + $0x58] sm:$0xff]  ;;  %v171_v54 = vld [vmem:[#allocation3 + $0x50] sm:$0xff] }
   0xd   :  { %97 = vmatpush.msra.mxu0 %v77_v7  ;;  %192 = vmatpush.msra.mxu1 %v175_v48  ;;  %v170_v55 = vld [vmem:[#allocation3 + $0x48] sm:$0xff]  ;;  %v169_v56 = vld [vmem:[#allocation3 + $0x40] sm:$0xff]  ;;  %v41_v57 = vld [vmem:[%s672_s2 + $0x20] sm:$0xff] }
   0xe   :  { %48 = vst.msk [vmem:[%s674_s4 + $0x20] sm:$0xff] %vm43_vm0, %v41_v57  ;;  %v428_v62 = vld [vmem:[#allocation3 + $0xc1] ss:$0 sm:$0xff] }
   0xf   :  { %v63_v3 = vld [vmem:[%s674_s4] sm:$0xff]  ;;  %98 = vmatpush.msra.mxu0 %v76_v8  ;;  %193 = vmatpush.msra.mxu1 %v174_v49 }
  0x10   :  { %67 = vrot.lane.b32.xlu0 %v63_v3, %s511_s29 }
  0x11   :  { %99 = vmatpush.msra.mxu0 %v75_v9  ;;  %194 = vmatpush.msra.mxu1 %v173_v52 }
  0x12   :  { %v400_v24 = vld [vmem:[%s674_s4 + $0x18] sm:$0xff] }
  0x13   :  { %100 = vmatpush.msra.mxu0 %v74_v10  ;;  %v404_v46 = vld [vmem:[%s674_s4 + $0x8] sm:$0xff]  ;;  %195 = vmatpush.msra.mxu1 %v172_v53 }
  0x15   :  { %101 = vmatpush.msra.mxu0 %v73_v11  ;;  %196 = vmatpush.msra.mxu1 %v171_v54  ;;  %v405_v58 = vld [vmem:[%s674_s4 + $0x20] sm:$0xff] }
  0x17   :  { %102 = vmatpush.msra.mxu0 %v72_v12  ;;  %197 = vmatpush.msra.mxu1 %v170_v55 }
  0x19   :  { %198 = vmatpush.msra.mxu1 %v169_v56 }
  0x7a   :  { %v57_v15 = vpop.permute.xlu0 %56 }
  0x7b   :  { %vm58_vm3 = vcmp.eq.s32.totalorder %v57_v15, %v54_v14 }
  0x7c   :  { %v399_v16 = vsel %vm58_vm3, 1.0, %v512_v6 }
  0x7d   :  { %62 = vst.msk [vmem:[#allocation2] sm:$0xff] %vm61_vm2, %v399_v16 }
  0x82   :  { %v68_v17 = vpop.permute.xlu0 %67 }
  0x83   :  { %71 = vst.msk [vmem:[#allocation2] sm:$0xff] %vm70_vm4, %v68_v17 }
  0x8a   :  { %v81_v18 = vld [vmem:[#allocation2] sm:$0xff] }
  0x8b   :  { %401 = vmatmul.msk.f32.vlgmr.msra.gmra.mxu0 %vm50_vm1, %v81_v18 }
 0x108   :  { %v104_v21 = vpop.f32.mrf.mxu0 }
 0x109   :  { %v105_v22 = vadd.f32 %v427_v20, %v104_v21 }
 0x10b   :  { %431 = vtanh.f32 %v105_v22  ;;  %v402_v25 = vmul.f32 -1.442695, %v105_v22  ;;  %v39_v22 = vld [vmem:[%s672_s2 + $0x10] sm:$0xff] }
 0x10c   :  { %46 = vst.msk [vmem:[%s674_s4 + $0x10] sm:$0xff] %vm43_vm0, %v39_v22 }
 0x10d   :  { %433 = vpow2.f32 %v402_v25  ;;  %v270_v25 = vld [vmem:[#allocation3 + $0xb0] sm:$0xff] }
 0x111   :  { %v432_v23 = vpop.eup %431 }
 0x112   :  { %133 = vrot.lane.b32.xlu1 %v432_v23, %s513_s7 }
 0x113   :  { %v434_v26 = vpop.eup %433  ;;  %v410_v23 = vld [vmem:[%s674_s4 + $0x10] sm:$0xff] }
 0x114   :  { %v110_v27 = vadd.f32 1.0, %v434_v26  ;;  %v269_v26 = vld [vmem:[#allocation3 + $0xa8] sm:$0xff] }
 0x116   :  { %435 = vrcp.f32 %v110_v27  ;;  %v122_v33 = vand.u32 2147483648, %v110_v27  ;;  %vm116_vm6 = vweird.f32 %v110_v27  ;;  %v120_v34 = vand.u32 2147483647, %v110_v27 }
 0x118   :  { %v123_v36 = vor.u32 1.1754944e-38, %v122_v33  ;;  %vm121_vm8 = vcmp.eq.f32.partialorder %v120_v34, 8.507059e+37  ;;  %v264_v33 = vld [vmem:[#allocation3 + $0x80] sm:$0xff] }
 0x119   :  { %v42_v34 = vld [vmem:[%s672_s2 + $0x28] sm:$0xff]  ;;  %s514_s2 = smov 96  }
 0x11a   :  { %128 = vrot.lane.b32.xlu1 %v400_v24, %s511_s29  ;;  %v271_v24 = vld [vmem:[#allocation3 + $0xb8] sm:$0xff]  ;;  %49 = vst.msk [vmem:[%s674_s4 + $0x28] sm:$0xff] %vm43_vm0, %v42_v34 }
 0x11b   :  { %286 = vmatpush.msra.mxu2 %v271_v24 }
 0x11c   :  { %v436_v28 = vpop.eup %435 }
 0x11d   :  { %v112_v29 = vmul.f32 %v436_v28, %v110_v27  ;;  %vm117_vm5 = vweird.f32 %v436_v28  ;;  %287 = vmatpush.msra.mxu2 %v270_v25 }
 0x11e   :  { %vm118_vm7 = vmor %vm116_vm6, %vm117_vm5 }
 0x11f   :  { %v113_v30 = vsub.f32 1.0, %v112_v29  ;;  %288 = vmatpush.msra.mxu2 %v269_v26  ;;  %v268_v29 = vld [vmem:[#allocation3 + $0xa0] sm:$0xff] }
 0x121   :  { %v114_v31 = vmul.f32 %v436_v28, %v113_v30  ;;  %289 = vmatpush.msra.mxu2 %v268_v29  ;;  %v267_v30 = vld [vmem:[#allocation3 + $0x98] sm:$0xff] }
 0x122   :  { %165 = vrot.lane.b32.xlu1 %v404_v46, %s511_s29 }
 0x123   :  { %v115_v32 = vadd.f32 %v436_v28, %v114_v31  ;;  %v266_v31 = vld [vmem:[#allocation3 + $0x90] sm:$0xff]  ;;  %290 = vmatpush.msra.mxu2 %v267_v30 }
 0x125   :  { %v119_v35 = vsel %vm118_vm7, %v436_v28, %v115_v32  ;;  %v265_v32 = vld [vmem:[#allocation3 + $0x88] sm:$0xff]  ;;  %291 = vmatpush.msra.mxu2 %v266_v31 }
 0x126   :  { %v124_v38 = vsel %vm121_vm8, %v123_v36, %v119_v35  ;;  %v411_v35 = vld [vmem:[%s674_s4 + $0x28] sm:$0xff] }
 0x127   :  { %292 = vmatpush.msra.mxu2 %v265_v32 }
 0x129   :  { %293 = vmatpush.msra.mxu2 %v264_v33 }
 0x184   :  { %v134_v37 = vpop.permute.xlu1 %133 }
 0x185   :  { %v136_v39 = vmul.f32 %v134_v37, %v124_v38 }
 0x187   :  { %138 = vrot.lane.b32.xlu2 %v136_v39, %s511_s29  ;;  %v429_v39 = vld [vmem:[#allocation3 + $0xc2] ss:$0 sm:$0xff] }
 0x18c   :  { %v129_v40 = vpop.permute.xlu1 %128 }
 0x18d   :  { %v131_v41 = vmul.f32 %v129_v40, %v124_v38 }
 0x194   :  { %v166_v60 = vpop.permute.xlu1 %165 }
 0x1e1   :  { %v139_v42 = vpop.permute.xlu2 %138 }
 0x1e2   :  { %v574_v43 = vadd.f32 %v139_v42, %v131_v41 }
 0x1e4   :  { %437 = vtanh.f32 %v574_v43 }
 0x1ea   :  { %v438_v44 = vpop.eup %437 }
 0x1eb   :  { %144 = vrot.lane.b32.xlu2 %v438_v44, %s513_s7 }
 0x245   :  { %v145_v50 = vpop.permute.xlu2 %144 }
 0x246   :  { %v147_v51 = vmul.f32 %v145_v50, %v124_v38 }
 0x248   :  { %149 = vrot.lane.b32.xlu0 %v147_v51, %s511_s29 }
 0x250   :  { %224 = vrot.lane.b32.xlu0 %v405_v58, %s511_s29 }
 0x2ba   :  { %v150_v59 = vpop.permute.xlu0 %149 }
 0x2bb   :  { %153 = vst.msk [vmem:[%s674_s4] sm:$0xff] %vm43_vm0, %v150_v59 }
 0x2bc   :  { %159 = vst.msk [vmem:[#allocation2] sm:$0xff] %vm43_vm0, %v150_v59 }
 0x2bd   :  { %168 = vst.msk [vmem:[#allocation2] sm:$0xff] %vm70_vm4, %v166_v60 }
 0x2c2   :  { %v225_v17 = vpop.permute.xlu0 %224 }
 0x2c4   :  { %v178_v61 = vld [vmem:[#allocation2] sm:$0xff] }
 0x2c5   :  { %406 = vmatmul.msk.f32.vlgmr.msra.gmra.mxu1 %vm50_vm1, %v178_v61 }
 0x342   :  { %v200_v63 = vpop.f32.mrf.mxu1 }
 0x343   :  { %v201_v0 = vadd.f32 %v428_v62, %v200_v63 }
 0x345   :  { %439 = vtanh.f32 %v201_v0  ;;  %v407_v2 = vmul.f32 -1.442695, %v201_v0 }
 0x347   :  { %441 = vpow2.f32 %v407_v2  ;;  %v351_v2 = vld [vmem:[#allocation3 + $0xd8] sm:$0xff] }
 0x34b   :  { %v440_v1 = vpop.eup %439 }
 0x34c   :  { %229 = vrot.lane.b32.xlu2 %v440_v1, %s513_s7  ;;  %v352_v1 = vld [vmem:[#allocation3 + $0xe0] sm:$0xff] }
 0x34d   :  { %v442_v3 = vpop.eup %441  ;;  %369 = vmatpush.msra.mxu3 %v352_v1 }
 0x34e   :  { %v206_v4 = vadd.f32 1.0, %v442_v3  ;;  %v349_v3 = vld [vmem:[#allocation3 + $0xc8] sm:$0xff] }
 0x34f   :  { %370 = vmatpush.msra.mxu3 %v351_v2 }
 0x350   :  { %443 = vrcp.f32 %v206_v4  ;;  %v218_v10 = vand.u32 2147483648, %v206_v4  ;;  %vm212_vm10 = vweird.f32 %v206_v4  ;;  %v216_v11 = vand.u32 2147483647, %v206_v4 }
 0x352   :  { %v219_v13 = vor.u32 1.1754944e-38, %v218_v10  ;;  %vm217_vm12 = vcmp.eq.f32.partialorder %v216_v11, 8.507059e+37 }
 0x356   :  { %v444_v5 = vpop.eup %443 }
 0x357   :  { %v208_v6 = vmul.f32 %v444_v5, %v206_v4  ;;  %vm213_vm9 = vweird.f32 %v444_v5 }
 0x358   :  { %vm214_vm11 = vmor %vm212_vm10, %vm213_vm9 }
 0x359   :  { %v209_v7 = vsub.f32 1.0, %v208_v6 }
 0x35b   :  { %v210_v8 = vmul.f32 %v444_v5, %v209_v7 }
 0x35d   :  { %v211_v9 = vadd.f32 %v444_v5, %v210_v8 }
 0x35f   :  { %v215_v12 = vsel %vm214_vm11, %v444_v5, %v211_v9  ;;  %v430_v9 = vld [vmem:[#allocation3 + $0xe8] ss:$0 sm:$0xff] }
 0x360   :  { %v220_v14 = vsel %vm217_vm12, %v219_v13, %v215_v12 }
 0x361   :  { %v227_v18 = vmul.f32 %v225_v17, %v220_v14 }
 0x3a6   :  { %v230_v15 = vpop.permute.xlu2 %229 }
 0x3a7   :  { %v232_v16 = vmul.f32 %v230_v15, %v220_v14 }
 0x3a9   :  { %234 = vrot.lane.b32.xlu1 %v232_v16, %s511_s29 }
 0x3b1   :  { %260 = vrot.lane.b32.xlu1 %v410_v23, %s511_s29 }
 0x41b   :  { %v235_v19 = vpop.permute.xlu1 %234 }
 0x41c   :  { %v610_v20 = vadd.f32 %v235_v19, %v227_v18 }
 0x41e   :  { %445 = vtanh.f32 %v610_v20 }
 0x423   :  { %v261_v37 = vpop.permute.xlu1 %260 }
 0x424   :  { %v446_v21 = vpop.eup %445 }
 0x425   :  { %240 = vrot.lane.b32.xlu2 %v446_v21, %s513_s7 }
 0x47f   :  { %v241_v27 = vpop.permute.xlu2 %240 }
 0x480   :  { %v243_v28 = vmul.f32 %v241_v27, %v220_v14 }
 0x482   :  { %245 = vrot.lane.b32.xlu0 %v243_v28, %s511_s29 }
 0x48a   :  { %319 = vrot.lane.b32.xlu0 %v411_v35, %s511_s29 }
 0x4f4   :  { %v246_v36 = vpop.permute.xlu0 %245 }
 0x4f5   :  { %408 = vst.msk [vmem:[%s674_s4 + $0x8] sm:$0xff] %vm43_vm0, %v246_v36 }
 0x4f6   :  { %254 = vst.msk [vmem:[#allocation2] sm:$0xff] %vm43_vm0, %v246_v36 }
 0x4f7   :  { %263 = vst.msk [vmem:[#allocation2] sm:$0xff] %vm70_vm4, %v261_v37 }
 0x4fc   :  { %v320_v59 = vpop.permute.xlu0 %319 }
 0x4fe   :  { %v273_v38 = vld [vmem:[#allocation2] sm:$0xff] }
 0x4ff   :  { %412 = vmatmul.msk.f32.vlgmr.msra.gmra.mxu2 %vm50_vm1, %v273_v38 }
 0x582   :  { %v295_v40 = vpop.f32.mrf.mxu2 }
 0x583   :  { %v296_v41 = vadd.f32 %v429_v39, %v295_v40 }
 0x585   :  { %447 = vtanh.f32 %v296_v41  ;;  %v413_v44 = vmul.f32 -1.442695, %v296_v41 }
 0x587   :  { %449 = vpow2.f32 %v413_v44 }
 0x58b   :  { %v448_v42 = vpop.eup %447 }
 0x58c   :  { %324 = vrot.lane.b32.xlu2 %v448_v42, %s513_s7 }
 0x58d   :  { %v450_v45 = vpop.eup %449 }
 0x58e   :  { %v301_v46 = vadd.f32 1.0, %v450_v45 }
 0x590   :  { %451 = vrcp.f32 %v301_v46  ;;  %v313_v52 = vand.u32 2147483648, %v301_v46  ;;  %vm307_vm14 = vweird.f32 %v301_v46  ;;  %v311_v53 = vand.u32 2147483647, %v301_v46 }
 0x592   :  { %v314_v55 = vor.u32 1.1754944e-38, %v313_v52  ;;  %vm312_vm1 = vcmp.eq.f32.partialorder %v311_v53, 8.507059e+37 }
 0x596   :  { %v452_v47 = vpop.eup %451 }
 0x597   :  { %v303_v48 = vmul.f32 %v452_v47, %v301_v46  ;;  %vm308_vm13 = vweird.f32 %v452_v47 }
 0x598   :  { %vm309_vm15 = vmor %vm307_vm14, %vm308_vm13 }
 0x599   :  { %v304_v49 = vsub.f32 1.0, %v303_v48 }
 0x59b   :  { %v305_v50 = vmul.f32 %v452_v47, %v304_v49 }
 0x59d   :  { %v306_v51 = vadd.f32 %v452_v47, %v305_v50 }
 0x59f   :  { %v310_v54 = vsel %vm309_vm15, %v452_v47, %v306_v51 }
 0x5a0   :  { %v315_v56 = vsel %vm312_vm1, %v314_v55, %v310_v54 }
 0x5a1   :  { %v322_v60 = vmul.f32 %v320_v59, %v315_v56 }
 0x5e6   :  { %v325_v57 = vpop.permute.xlu2 %324 }
 0x5e7   :  { %v327_v58 = vmul.f32 %v325_v57, %v315_v56 }
 0x5e9   :  { %329 = vrot.lane.b32.xlu1 %v327_v58, %s511_s29 }
 0x5f1   :  { %155 = vrot.lane.b32.xlu1 %v574_v43, %s514_s2  ;;  %v350_v43 = vld [vmem:[#allocation3 + $0xd0] sm:$0xff] }
 0x5f2   :  { %371 = vmatpush.msra.mxu3 %v350_v43 }
 0x5f4   :  { %372 = vmatpush.msra.mxu3 %v349_v3 }
 0x65b   :  { %v330_v61 = vpop.permute.xlu1 %329 }
 0x65c   :  { %v332_v62 = vadd.f32 %v330_v61, %v322_v60 }
 0x65e   :  { %453 = vtanh.f32 %v332_v62 }
 0x663   :  { %v156_v63 = vpop.permute.xlu1 %155 }
 0x664   :  { %v454_v0 = vpop.eup %453  ;;  %403 = vst.msk [vmem:[%s674_s4 + $0x18] sm:$0xff] %vm43_vm0, %v156_v63 }
 0x665   :  { %335 = vrot.lane.b32.xlu2 %v454_v0, %s513_s7 }
 0x66d   :  { %250 = vrot.lane.b32.xlu2 %v610_v20, %s514_s2 }
 0x6bf   :  { %v336_v4 = vpop.permute.xlu2 %335 }
 0x6c0   :  { %v338_v5 = vmul.f32 %v336_v4, %v315_v56 }
 0x6c2   :  { %340 = vrot.lane.b32.xlu0 %v338_v5, %s511_s29  ;;  %s515_s29 = smov [#allocation6]  }
 0x6c3   :  { %s383_s19 = sshll.u32 %s515_s29, 4  ;;  %s384_s19 = int_to_ptr.vmem [resolvable:$true] %s383_s19 }
 0x6c7   :  { %v251_v6 = vpop.permute.xlu2 %250 }
 0x6c8   :  { %409 = vst.msk [vmem:[%s674_s4 + $0x20] sm:$0xff] %vm43_vm0, %v251_v6 }
 0x6ca   :  { %345 = vrot.lane.b32.xlu0 %v332_v62, %s514_s2 }
 0x734   :  { %v341_v7 = vpop.permute.xlu0 %340 }
 0x735   :  { %414 = vst.msk [vmem:[%s674_s4 + $0x10] sm:$0xff] %vm43_vm0, %v341_v7  ;;  %416 = vmatmul.msk.f32.vlgmr.msra.gmra.mxu3 %vm43_vm0, %v341_v7 }
 0x73c   :  { %v346_v8 = vpop.permute.xlu0 %345 }
 0x73d   :  { %415 = vst.msk [vmem:[%s674_s4 + $0x28] sm:$0xff] %vm43_vm0, %v346_v8 }
 0x7b8   :  { %v374_v10 = vpop.f32.mrf.mxu3 }
 0x7b9   :  { %v375_v11 = vadd.f32 %v430_v9, %v374_v10 }
 0x7bb   :  { %377 = vst [vmem:[#allocation6] sm:$0xff] %v375_v11 }
 0x7bc   :  { %388 = dma.vmem_to_hbm [thread:$0]  %s384_s19, 128, %s386_s22, [#allocation5]  }
 0x7bd   :  { %505 = dma.done.wait [#allocation5], 128  }
 0x7be   :  { %506 = vsyncadd [#allocation5], 4294967168 }
 0x7bf   :  { %397 = vsyncpa [#allocation4], 1 }
 0x7c0   :  { %398 = vsyncpa [#allocation5], 1 }

</bundles_post_ra>
